<compile_context>
chip_gen: v7x
topology: tpu7x:2x2x1
jax: 0.10.0
libtpu: 0.0.40
codegen_flags: <defaults>
</compile_context>

<pallas_src>
import functools
import math

import jax
import jax.numpy as jnp
from jax.experimental import pallas as pl
from jax.experimental.pallas import tpu as pltpu


def _round_up(n, m):
    return ((n + m - 1) // m) * m


def _cdiv(a, b):
    return -(-a // b)


# -----------------------------------------------------------------------------------------
# Lane-aligned path (H % 128 == 0): per-spatial-slice (H,H) dots, VPU reductions,
# per-slice lane-aligned dvec stores.  vec1 is never materialized as a full (TN,3H) buffer.
def _fte_kernel_sliced(x_ref, v_ref,
                       w1_ref, w2_ref,
                       wu1x_ref, wu1s_ref, bu1_ref,
                       wdx_ref, bdx_ref, wx3_ref, bx3_ref,
                       dx_ref, dvec_ref, *, H, vd_scale):
    f32 = jnp.float32
    cdt = w1_ref.dtype                       # MXU operand dtype (f32 or bf16)
    x = x_ref[...]                           # (TN, H)
    w1 = w1_ref[...]
    w2 = w2_ref[...]

    vec2 = []                                # only vec2 stays live (needed later for dvec)
    s2 = None                                # sum_s vec1_s^2
    vd = None                                # sum_s vec1_s * vec2_s
    for s in range(3):                       # static unroll; slices lane-aligned (H % 128 == 0)
        vs = v_ref[:, s * H:(s + 1) * H]     # (TN, H)
        v1 = jnp.dot(vs, w1, preferred_element_type=f32)
        v2 = jnp.dot(vs, w2, preferred_element_type=f32)
        vec2.append(v2)
        s2 = v1 * v1 if s2 is None else s2 + v1 * v1
        vd = v1 * v2 if vd is None else vd + v1 * v2

    scalar = jnp.sqrt(s2)                    # (TN, H), f32

    # update-net layer 0 on cat([x, scalar]) without materializing the concat
    h = (jnp.dot(x, wu1x_ref[...], preferred_element_type=f32)
         + jnp.dot(scalar.astype(cdt), wu1s_ref[...], preferred_element_type=f32)
         + bu1_ref[...])
    h = h * jax.nn.sigmoid(h)                # SiLU in f32
    hc = h.astype(cdt)

    # dx = (xv1 + xv2 + vec_dot)/sqrt(2): (w1+w2)/sqrt(2) folded into wdx/bdx; vd_scale = 1/sqrt(2H)
    dx = jnp.dot(hc, wdx_ref[...], preferred_element_type=f32) + bdx_ref[...] + vd * vd_scale
    xvec3 = jnp.dot(hc, wx3_ref[...], preferred_element_type=f32) + bx3_ref[...]

    dx_ref[...] = dx.astype(dx_ref.dtype)
    for s in range(3):                       # lane-aligned stores; no broadcast-tiling matmul
        dvec_ref[:, s * H:(s + 1) * H] = (xvec3 * vec2[s]).astype(dvec_ref.dtype)


# -----------------------------------------------------------------------------------------
# Small / non-lane-aligned H path: fused block-diagonal equi_proj + indicator-matrix
# reductions (tiny MXU work at this size); dx and dvec are packed into one lane-dense
# (TN, 4H) output slab via two cheap selection matmuls (avoids masked partial stores).
def _fte_kernel_small(x_ref, v_ref,
                      we1_ref, we2_ref, ssum_ref, svd_ref, stile_ref,
                      wu1x_ref, wu1s_ref, bu1_ref,
                      wdx_ref, bdx_ref, wx3_ref, bx3_ref,
                      seldx_ref, seldv_ref, out_ref):
    f32 = jnp.float32
    cdt = we1_ref.dtype
    x = x_ref[...]                           # (TN, H)
    v = v_ref[...]                           # (TN, 3H) flattened (spatial, H) on lanes

    vec1 = jnp.dot(v, we1_ref[...], preferred_element_type=f32)   # (TN, 3H)
    vec2 = jnp.dot(v, we2_ref[...], preferred_element_type=f32)   # (TN, 3H)

    scalar = jnp.sqrt(jnp.dot(vec1 * vec1, ssum_ref[...], preferred_element_type=f32))  # (TN, H)
    vdot = jnp.dot(vec1 * vec2, svd_ref[...], preferred_element_type=f32)               # (TN, H)

    h = (jnp.dot(x, wu1x_ref[...], preferred_element_type=f32)
         + jnp.dot(scalar.astype(cdt), wu1s_ref[...], preferred_element_type=f32)
         + bu1_ref[...])
    h = h * jax.nn.sigmoid(h)                # SiLU
    hc = h.astype(cdt)

    dx = jnp.dot(hc, wdx_ref[...], preferred_element_type=f32) + bdx_ref[...] + vdot    # (TN, H)
    xvec3 = jnp.dot(hc, wx3_ref[...], preferred_element_type=f32) + bx3_ref[...]        # (TN, H)
    dvec = jnp.dot(xvec3, stile_ref[...], preferred_element_type=f32) * vec2            # (TN, 3H)

    packed = (jnp.dot(dx, seldx_ref[...], preferred_element_type=f32)
              + jnp.dot(dvec, seldv_ref[...], preferred_element_type=f32))              # (TN, 4H)
    out_ref[...] = packed.astype(out_ref.dtype)


def _choose_tile(N, tile_n, sublane):
    """Row-tile size: minimize zero-row padding, honor dtype sublane packing, cap by tile_n."""
    cap = max(sublane, (tile_n // sublane) * sublane)
    if N <= cap:
        tn = _round_up(N, sublane)
        if tn > 256:           # mid-sized single-tile: split so the v7x megacore gets >=2 steps
            tn = _round_up(_cdiv(N, 2), sublane)
        return tn
    cands = [c for c in (1024, 512, 256, 128) if c <= cap and c % sublane == 0]
    if not cands:
        return cap
    # minimize padded waste (padded rows are real compute/HBM traffic on a sequential grid),
    # tie-break toward larger tiles (better HBM-roofline fraction, fewer per-step overheads).
    return min(cands, key=lambda c: (_round_up(N, c) - N, -c))


def fte_forward(x, vec, params, node_frame=None, *, tile_n=512, compute_dtype=None):
    """FTE forward. x: (N,H), vec: (N,3,H) -> (dx (N,H), dvec (N,3,H)).

    node_frame is accepted for signature parity but (as in the PyTorch forward) does not affect
    the returned values ('scalrization' is dead code), so it is not sent to the kernel.
    """
    del node_frame
    N, H = x.shape
    assert vec.shape == (N, 3, H)
    H3, H4 = 3 * H, 4 * H
    inv_sqrt_2 = 1.0 / math.sqrt(2.0)
    inv_sqrt_h = 1.0 / math.sqrt(H)
    f32 = jnp.float32

    wdt = jnp.dtype(compute_dtype) if compute_dtype is not None else x.dtype

    # ---- weight preparation (tiny arrays, not the hot path) ------------------------------
    w_e = jnp.asarray(params["equi_proj_w"])              # (2H, H)   y = v @ w_e.T
    w1 = w_e[:H, :].T.astype(wdt)                         # (H, H)    vec1 half
    w2 = w_e[H:, :].T.astype(wdt)                         # (H, H)    vec2 half
    wu1 = jnp.asarray(params["xequi0_w"])                 # (H, 2H)
    wu1x = wu1[:, :H].T.astype(wdt)                       # acts on x
    wu1s = wu1[:, H:].T.astype(wdt)                       # acts on scalar
    bu1 = jnp.asarray(params["xequi0_b"]).reshape(1, H).astype(wdt)
    wu2 = jnp.asarray(params["xequi2_w"])                 # (3H, H)
    bu2 = jnp.asarray(params["xequi2_b"])                 # (3H,)
    w_dx = ((wu2[:H, :] + wu2[H:2 * H, :]).T * inv_sqrt_2).astype(wdt)   # (xv1+xv2)/sqrt(2)
    b_dx = (((bu2[:H] + bu2[H:2 * H]) * inv_sqrt_2).reshape(1, H)).astype(wdt)
    w_x3 = wu2[2 * H:, :].T.astype(wdt)
    b_x3 = bu2[2 * H:].reshape(1, H).astype(wdt)

    # ---- input layout: free (contiguous) reshape, no transpose ---------------------------
    vflat = vec.reshape(N, H3)
    x = x.astype(wdt)
    vflat = vflat.astype(wdt)
    out_dtype = wdt

    sublane = 16 if wdt == jnp.bfloat16 else 8
    tn = _choose_tile(N, tile_n, sublane)
    n_pad = _round_up(N, tn)
    if n_pad != N:                      # padded zero rows are safe: sqrt(0)=0, rows independent
        x = jnp.pad(x, ((0, n_pad - N), (0, 0)))
        vflat = jnp.pad(vflat, ((0, n_pad - N), (0, 0)))

    rows = lambda i: (i, 0)
    full = lambda i: (0, 0)
    compiler_params = pltpu.CompilerParams(dimension_semantics=("parallel",))

    if H % 128 == 0:
        kernel = functools.partial(_fte_kernel_sliced, H=H,
                                   vd_scale=inv_sqrt_2 * inv_sqrt_h)
        dx, dvec_flat = pl.pallas_call(
            kernel,
            out_shape=(jax.ShapeDtypeStruct((n_pad, H), out_dtype),
                       jax.ShapeDtypeStruct((n_pad, H3), out_dtype)),
            grid_spec=pltpu.PrefetchScalarGridSpec(
                num_scalar_prefetch=0,
                grid=(n_pad // tn,),
                in_specs=[
                    pl.BlockSpec((tn, H), rows),     # x
                    pl.BlockSpec((tn, H3), rows),    # vec (flattened)
                    pl.BlockSpec((H, H), full),      # w1
                    pl.BlockSpec((H, H), full),      # w2
                    pl.BlockSpec((H, H), full),      # wu1x
                    pl.BlockSpec((H, H), full),      # wu1s
                    pl.BlockSpec((1, H), full),      # bu1
                    pl.BlockSpec((H, H), full),      # w_dx
                    pl.BlockSpec((1, H), full),      # b_dx
                    pl.BlockSpec((H, H), full),      # w_x3
                    pl.BlockSpec((1, H), full),      # b_x3
                ],
                out_specs=(pl.BlockSpec((tn, H), rows),
                           pl.BlockSpec((tn, H3), rows)),
            ),
            compiler_params=compiler_params,
        )(x, vflat, w1, w2, wu1x, wu1s, bu1, w_dx, b_dx, w_x3, b_x3)
        dx = dx[:N]
        dvec = dvec_flat[:N].reshape(N, 3, H)
        return dx, dvec

    # ---- fallback: small / non-lane-aligned H --------------------------------------------
    eye3 = jnp.eye(3, dtype=wdt)
    we1_bd = jnp.kron(eye3, w1)                                           # (3H, 3H) block diag
    we2_bd = jnp.kron(eye3, w2)                                           # (3H, 3H)
    eyeH = jnp.eye(H, dtype=f32)
    s_sum = jnp.concatenate([eyeH, eyeH, eyeH], axis=0)                   # (3H, H) sum over spatial
    s_vd = s_sum * jnp.asarray(inv_sqrt_2 * inv_sqrt_h, f32)              # constants folded
    s_tile = jnp.concatenate([eyeH, eyeH, eyeH], axis=1)                  # (H, 3H) spatial tiling
    sel_dx = jnp.eye(H4, dtype=f32)[:H]                                   # (H, 4H): dx -> lanes [0,H)
    sel_dv = jnp.eye(H4, dtype=f32)[H:]                                   # (3H,4H): dvec -> [H,4H)

    out = pl.pallas_call(
        _fte_kernel_small,
        out_shape=jax.ShapeDtypeStruct((n_pad, H4), out_dtype),
        grid_spec=pltpu.PrefetchScalarGridSpec(
            num_scalar_prefetch=0,
            grid=(n_pad // tn,),
            in_specs=[
                pl.BlockSpec((tn, H), rows),      # x
                pl.BlockSpec((tn, H3), rows),     # vec (flattened)
                pl.BlockSpec((H3, H3), full),     # we1_bd
                pl.BlockSpec((H3, H3), full),     # we2_bd
                pl.BlockSpec((H3, H), full),      # s_sum
                pl.BlockSpec((H3, H), full),      # s_vd
                pl.BlockSpec((H, H3), full),      # s_tile
                pl.BlockSpec((H, H), full),       # wu1x
                pl.BlockSpec((H, H), full),       # wu1s
                pl.BlockSpec((1, H), full),       # bu1
                pl.BlockSpec((H, H), full),       # w_dx
                pl.BlockSpec((1, H), full),       # b_dx
                pl.BlockSpec((H, H), full),       # w_x3
                pl.BlockSpec((1, H), full),       # b_x3
                pl.BlockSpec((H, H4), full),      # sel_dx
                pl.BlockSpec((H3, H4), full),     # sel_dv
            ],
            out_specs=pl.BlockSpec((tn, H4), rows),
        ),
        compiler_params=compiler_params,
    )(x, vflat, we1_bd, we2_bd, s_sum, s_vd, s_tile,
      wu1x, wu1s, bu1, w_dx, b_dx, w_x3, b_x3, sel_dx, sel_dv)

    dx = out[:N, :H]
    dvec = out[:N, H:].reshape(N, 3, H)                   # free reshape
    return dx, dvec


# ------------------------------- reference & demo -----------------------------------------
def init_params(key, H):
    """Xavier-uniform weights (as in reset_parameters); small nonzero biases so the
    bias-folding paths are exercised numerically (PyTorch init zeros them)."""
    def xavier(k, shape):                 # PyTorch Linear weight is (out, in)
        fan_out, fan_in = shape
        bound = (6.0 / (fan_in + fan_out)) ** 0.5
        return jax.random.uniform(k, shape, jnp.float32, -bound, bound)
    k1, k2, k3, k4, k5 = jax.random.split(key, 5)
    return {
        "equi_proj_w": xavier(k1, (2 * H, H)),
        "xequi0_w":    xavier(k2, (H, 2 * H)),
        "xequi0_b":    0.1 * jax.random.normal(k4, (H,), jnp.float32),
        "xequi2_w":    xavier(k3, (3 * H, H)),
        "xequi2_b":    0.1 * jax.random.normal(k5, (3 * H,), jnp.float32),
    }


def fte_ref(x, vec, node_frame, p):
    """Pure-JAX mirror of the PyTorch FTE.forward (scalrization is dead code -> skipped)."""
    del node_frame
    H = x.shape[1]
    vproj = jnp.einsum("nsh,kh->nsk", vec, p["equi_proj_w"])     # (N,3,2H)
    vec1, vec2 = vproj[..., :H], vproj[..., H:]
    scalar = jnp.linalg.norm(vec1, axis=-2)                      # (N,H)
    vec_dot = (vec1 * vec2).sum(axis=1) * (1.0 / math.sqrt(H))   # (N,H)
    xc = jnp.concatenate([x, scalar], axis=-1)
    h = xc @ p["xequi0_w"].T + p["xequi0_b"]
    h = h * jax.nn.sigmoid(h)
    o = h @ p["xequi2_w"].T + p["xequi2_b"]
    xv1, xv2, xv3 = o[:, :H], o[:, H:2 * H], o[:, 2 * H:]
    dx = (xv1 + xv2 + vec_dot) * (1.0 / math.sqrt(2.0))
    dvec = xv3[:, None, :] * vec2
    return dx, dvec


if __name__ == "__main__":
    key = jax.random.PRNGKey(0)

    def run_case(N, H, compute_dtype, atol, rtol):
        ck = jax.random.fold_in(key, 1000 * H + N)
        kx, kv, kf, kp = jax.random.split(ck, 4)
        x = jax.random.normal(kx, (N, H), jnp.float32)
        vec = jax.random.normal(kv, (N, 3, H), jnp.float32)
        node_frame = jax.random.normal(kf, (N, 3, 3), jnp.float32)  # unused by forward outputs
        params = init_params(kp, H)

        dx, dvec = fte_forward(x, vec, params, node_frame, compute_dtype=compute_dtype)
        dx = jax.block_until_ready(dx)
        dvec = jax.block_until_ready(dvec)

        dx_ref, dvec_ref = fte_ref(x, vec, node_frame, params)
        assert dx.shape == (N, H) and dvec.shape == (N, 3, H)
        e_dx = jnp.max(jnp.abs(dx.astype(jnp.float32) - dx_ref))
        e_dv = jnp.max(jnp.abs(dvec.astype(jnp.float32) - dvec_ref))
        assert jnp.allclose(dx.astype(jnp.float32), dx_ref, atol=atol, rtol=rtol), \
            f"dx max abs err {e_dx} (N={N}, H={H}, dtype={compute_dtype})"
        assert jnp.allclose(dvec.astype(jnp.float32), dvec_ref, atol=atol, rtol=rtol), \
            f"dvec max abs err {e_dv} (N={N}, H={H}, dtype={compute_dtype})"

    run_case(16, 32, None, 1e-4, 1e-4)             # small-H path (block-diag + packed 4H output)
    run_case(20, 128, None, 1e-4, 1e-4)            # lane-aligned sliced path + row padding
    run_case(16, 128, jnp.bfloat16, 0.25, 0.25)    # bf16 operands (weights cast too), loose check
    print("KERNEL_OK")
</pallas_src>

<mosaic_0001>
module attributes {stable_mosaic.version = 11 : i64} {
  func.func @_fte_kernel_small(%arg0: i32, %arg1: memref<16x32xf32, #tpu.memory_space<vmem>>, %arg2: memref<16x96xf32, #tpu.memory_space<vmem>>, %arg3: memref<96x96xf32, #tpu.memory_space<vmem>>, %arg4: memref<96x96xf32, #tpu.memory_space<vmem>>, %arg5: memref<96x32xf32, #tpu.memory_space<vmem>>, %arg6: memref<96x32xf32, #tpu.memory_space<vmem>>, %arg7: memref<32x96xf32, #tpu.memory_space<vmem>>, %arg8: memref<32x32xf32, #tpu.memory_space<vmem>>, %arg9: memref<32x32xf32, #tpu.memory_space<vmem>>, %arg10: memref<1x32xf32, #tpu.memory_space<vmem>>, %arg11: memref<32x32xf32, #tpu.memory_space<vmem>>, %arg12: memref<1x32xf32, #tpu.memory_space<vmem>>, %arg13: memref<32x32xf32, #tpu.memory_space<vmem>>, %arg14: memref<1x32xf32, #tpu.memory_space<vmem>>, %arg15: memref<32x128xf32, #tpu.memory_space<vmem>>, %arg16: memref<96x128xf32, #tpu.memory_space<vmem>>, %arg17: memref<16x128xf32, #tpu.memory_space<vmem>>) attributes {dimension_semantics = [#tpu.dimension_semantics<parallel>], iteration_bounds = array<i64: 1>, scalar_prefetch = 0 : i64, scratch_operands = 0 : i64, tpu.core_type = #tpu.core_type<tc>, window_params = [{transform_indices = @transform_0, window_bounds = array<i64: 16, 32>}, {transform_indices = @transform_1, window_bounds = array<i64: 16, 96>}, {pipeline_mode = #tpu.pipeline_mode<synchronous>, transform_indices = @transform_2, window_bounds = array<i64: 96, 96>}, {pipeline_mode = #tpu.pipeline_mode<synchronous>, transform_indices = @transform_3, window_bounds = array<i64: 96, 96>}, {pipeline_mode = #tpu.pipeline_mode<synchronous>, transform_indices = @transform_4, window_bounds = array<i64: 96, 32>}, {pipeline_mode = #tpu.pipeline_mode<synchronous>, transform_indices = @transform_5, window_bounds = array<i64: 96, 32>}, {pipeline_mode = #tpu.pipeline_mode<synchronous>, transform_indices = @transform_6, window_bounds = array<i64: 32, 96>}, {pipeline_mode = #tpu.pipeline_mode<synchronous>, transform_indices = @transform_7, window_bounds = array<i64: 32, 32>}, {pipeline_mode = #tpu.pipeline_mode<synchronous>, transform_indices = @transform_8, window_bounds = array<i64: 32, 32>}, {pipeline_mode = #tpu.pipeline_mode<synchronous>, transform_indices = @transform_9, window_bounds = array<i64: 1, 32>}, {pipeline_mode = #tpu.pipeline_mode<synchronous>, transform_indices = @transform_10, window_bounds = array<i64: 32, 32>}, {pipeline_mode = #tpu.pipeline_mode<synchronous>, transform_indices = @transform_11, window_bounds = array<i64: 1, 32>}, {pipeline_mode = #tpu.pipeline_mode<synchronous>, transform_indices = @transform_12, window_bounds = array<i64: 32, 32>}, {pipeline_mode = #tpu.pipeline_mode<synchronous>, transform_indices = @transform_13, window_bounds = array<i64: 1, 32>}, {pipeline_mode = #tpu.pipeline_mode<synchronous>, transform_indices = @transform_14, window_bounds = array<i64: 32, 128>}, {pipeline_mode = #tpu.pipeline_mode<synchronous>, transform_indices = @transform_15, window_bounds = array<i64: 96, 128>}, {transform_indices = @transform_16, window_bounds = array<i64: 16, 128>}]} {
    %c0 = arith.constant 0 : index
    %c0_0 = arith.constant 0 : index
    %0 = vector.load %arg1[%c0, %c0_0] : memref<16x32xf32, #tpu.memory_space<vmem>>, vector<16x32xf32>
    %c0_1 = arith.constant 0 : index
    %c0_2 = arith.constant 0 : index
    %1 = vector.load %arg2[%c0_1, %c0_2] : memref<16x96xf32, #tpu.memory_space<vmem>>, vector<16x96xf32>
    %c0_3 = arith.constant 0 : index
    %c0_4 = arith.constant 0 : index
    %2 = vector.load %arg3[%c0_3, %c0_4] : memref<96x96xf32, #tpu.memory_space<vmem>>, vector<96x96xf32>
    %cst = arith.constant dense<0.000000e+00> : vector<16x96xf32>
    %3 = tpu.matmul %1, %2, %cst {dimension_numbers = #tpu.dot_dimension_numbers<[1], [0], [0], [1], [0, 0, 1, 1], [], []>} : vector<16x96xf32>, vector<96x96xf32>, vector<16x96xf32> -> vector<16x96xf32>
    %c0_5 = arith.constant 0 : index
    %c0_6 = arith.constant 0 : index
    %4 = vector.load %arg4[%c0_5, %c0_6] : memref<96x96xf32, #tpu.memory_space<vmem>>, vector<96x96xf32>
    %cst_7 = arith.constant dense<0.000000e+00> : vector<16x96xf32>
    %5 = tpu.matmul %1, %4, %cst_7 {dimension_numbers = #tpu.dot_dimension_numbers<[1], [0], [0], [1], [0, 0, 1, 1], [], []>} : vector<16x96xf32>, vector<96x96xf32>, vector<16x96xf32> -> vector<16x96xf32>
    %6 = arith.mulf %3, %3 : vector<16x96xf32>
    %c0_8 = arith.constant 0 : index
    %c0_9 = arith.constant 0 : index
    %7 = vector.load %arg5[%c0_8, %c0_9] : memref<96x32xf32, #tpu.memory_space<vmem>>, vector<96x32xf32>
    %cst_10 = arith.constant dense<0.000000e+00> : vector<16x32xf32>
    %8 = tpu.matmul %6, %7, %cst_10 {dimension_numbers = #tpu.dot_dimension_numbers<[1], [0], [0], [1], [0, 0, 1, 1], [], []>} : vector<16x96xf32>, vector<96x32xf32>, vector<16x32xf32> -> vector<16x32xf32>
    %9 = math.sqrt %8 : vector<16x32xf32>
    %10 = arith.mulf %3, %5 : vector<16x96xf32>
    %c0_11 = arith.constant 0 : index
    %c0_12 = arith.constant 0 : index
    %11 = vector.load %arg6[%c0_11, %c0_12] : memref<96x32xf32, #tpu.memory_space<vmem>>, vector<96x32xf32>
    %cst_13 = arith.constant dense<0.000000e+00> : vector<16x32xf32>
    %12 = tpu.matmul %10, %11, %cst_13 {dimension_numbers = #tpu.dot_dimension_numbers<[1], [0], [0], [1], [0, 0, 1, 1], [], []>} : vector<16x96xf32>, vector<96x32xf32>, vector<16x32xf32> -> vector<16x32xf32>
    %c0_14 = arith.constant 0 : index
    %c0_15 = arith.constant 0 : index
    %13 = vector.load %arg8[%c0_14, %c0_15] : memref<32x32xf32, #tpu.memory_space<vmem>>, vector<32x32xf32>
    %cst_16 = arith.constant dense<0.000000e+00> : vector<16x32xf32>
    %14 = tpu.matmul %0, %13, %cst_16 {dimension_numbers = #tpu.dot_dimension_numbers<[1], [0], [0], [1], [0, 0, 1, 1], [], []>} : vector<16x32xf32>, vector<32x32xf32>, vector<16x32xf32> -> vector<16x32xf32>
    %c0_17 = arith.constant 0 : index
    %c0_18 = arith.constant 0 : index
    %15 = vector.load %arg9[%c0_17, %c0_18] : memref<32x32xf32, #tpu.memory_space<vmem>>, vector<32x32xf32>
    %cst_19 = arith.constant dense<0.000000e+00> : vector<16x32xf32>
    %16 = tpu.matmul %9, %15, %cst_19 {dimension_numbers = #tpu.dot_dimension_numbers<[1], [0], [0], [1], [0, 0, 1, 1], [], []>} : vector<16x32xf32>, vector<32x32xf32>, vector<16x32xf32> -> vector<16x32xf32>
    %17 = arith.addf %14, %16 : vector<16x32xf32>
    %c0_20 = arith.constant 0 : index
    %c0_21 = arith.constant 0 : index
    %18 = vector.load %arg10[%c0_20, %c0_21] : memref<1x32xf32, #tpu.memory_space<vmem>>, vector<1x32xf32>
    %19 = vector.broadcast %18 : vector<1x32xf32> to vector<16x32xf32>
    %20 = arith.addf %17, %19 : vector<16x32xf32>
    %21 = arith.negf %20 : vector<16x32xf32>
    %22 = math.exp %21 : vector<16x32xf32>
    %cst_22 = arith.constant 1.000000e+00 : f32
    %23 = vector.broadcast %cst_22 : f32 to vector<16x32xf32>
    %24 = arith.addf %23, %22 : vector<16x32xf32>
    %25 = arith.divf %23, %24 : vector<16x32xf32>
    %26 = arith.mulf %20, %25 : vector<16x32xf32>
    %c0_23 = arith.constant 0 : index
    %c0_24 = arith.constant 0 : index
    %27 = vector.load %arg11[%c0_23, %c0_24] : memref<32x32xf32, #tpu.memory_space<vmem>>, vector<32x32xf32>
    %cst_25 = arith.constant dense<0.000000e+00> : vector<16x32xf32>
    %28 = tpu.matmul %26, %27, %cst_25 {dimension_numbers = #tpu.dot_dimension_numbers<[1], [0], [0], [1], [0, 0, 1, 1], [], []>} : vector<16x32xf32>, vector<32x32xf32>, vector<16x32xf32> -> vector<16x32xf32>
    %c0_26 = arith.constant 0 : index
    %c0_27 = arith.constant 0 : index
    %29 = vector.load %arg12[%c0_26, %c0_27] : memref<1x32xf32, #tpu.memory_space<vmem>>, vector<1x32xf32>
    %30 = vector.broadcast %29 : vector<1x32xf32> to vector<16x32xf32>
    %31 = arith.addf %28, %30 : vector<16x32xf32>
    %32 = arith.addf %31, %12 : vector<16x32xf32>
    %c0_28 = arith.constant 0 : index
    %c0_29 = arith.constant 0 : index
    %33 = vector.load %arg13[%c0_28, %c0_29] : memref<32x32xf32, #tpu.memory_space<vmem>>, vector<32x32xf32>
    %cst_30 = arith.constant dense<0.000000e+00> : vector<16x32xf32>
    %34 = tpu.matmul %26, %33, %cst_30 {dimension_numbers = #tpu.dot_dimension_numbers<[1], [0], [0], [1], [0, 0, 1, 1], [], []>} : vector<16x32xf32>, vector<32x32xf32>, vector<16x32xf32> -> vector<16x32xf32>
    %c0_31 = arith.constant 0 : index
    %c0_32 = arith.constant 0 : index
    %35 = vector.load %arg14[%c0_31, %c0_32] : memref<1x32xf32, #tpu.memory_space<vmem>>, vector<1x32xf32>
    %36 = vector.broadcast %35 : vector<1x32xf32> to vector<16x32xf32>
    %37 = arith.addf %34, %36 : vector<16x32xf32>
    %c0_33 = arith.constant 0 : index
    %c0_34 = arith.constant 0 : index
    %38 = vector.load %arg7[%c0_33, %c0_34] : memref<32x96xf32, #tpu.memory_space<vmem>>, vector<32x96xf32>
    %cst_35 = arith.constant dense<0.000000e+00> : vector<16x96xf32>
    %39 = tpu.matmul %37, %38, %cst_35 {dimension_numbers = #tpu.dot_dimension_numbers<[1], [0], [0], [1], [0, 0, 1, 1], [], []>} : vector<16x32xf32>, vector<32x96xf32>, vector<16x96xf32> -> vector<16x96xf32>
    %40 = arith.mulf %39, %5 : vector<16x96xf32>
    %c0_36 = arith.constant 0 : index
    %c0_37 = arith.constant 0 : index
    %41 = vector.load %arg15[%c0_36, %c0_37] : memref<32x128xf32, #tpu.memory_space<vmem>>, vector<32x128xf32>
    %cst_38 = arith.constant dense<0.000000e+00> : vector<16x128xf32>
    %42 = tpu.matmul %32, %41, %cst_38 {dimension_numbers = #tpu.dot_dimension_numbers<[1], [0], [0], [1], [0, 0, 1, 1], [], []>} : vector<16x32xf32>, vector<32x128xf32>, vector<16x128xf32> -> vector<16x128xf32>
    %c0_39 = arith.constant 0 : index
    %c0_40 = arith.constant 0 : index
    %43 = vector.load %arg16[%c0_39, %c0_40] : memref<96x128xf32, #tpu.memory_space<vmem>>, vector<96x128xf32>
    %cst_41 = arith.constant dense<0.000000e+00> : vector<16x128xf32>
    %44 = tpu.matmul %40, %43, %cst_41 {dimension_numbers = #tpu.dot_dimension_numbers<[1], [0], [0], [1], [0, 0, 1, 1], [], []>} : vector<16x96xf32>, vector<96x128xf32>, vector<16x128xf32> -> vector<16x128xf32>
    %45 = arith.addf %42, %44 : vector<16x128xf32>
    %c0_42 = arith.constant 0 : index
    %c0_43 = arith.constant 0 : index
    %46 = vector.load %arg17[%c0_42, %c0_43] : memref<16x128xf32, #tpu.memory_space<vmem>>, vector<16x128xf32>
    tpu.vector_store %arg17[%c0_42, %c0_43], %45 {strides = array<i32>} : memref<16x128xf32, #tpu.memory_space<vmem>>, vector<16x128xf32>,
    return
  }
  func.func @transform_0(%arg0: i32) -> (i32, i32) {
    %c0_i32 = arith.constant 0 : i32
    %c0_i32_0 = arith.constant 0 : i32
    return %arg0, %c0_i32 : i32, i32
  }
  func.func @transform_1(%arg0: i32) -> (i32, i32) {
    %c0_i32 = arith.constant 0 : i32
    %c0_i32_0 = arith.constant 0 : i32
    return %arg0, %c0_i32 : i32, i32
  }
  func.func @transform_2(%arg0: i32) -> (i32, i32) {
    %c0_i32 = arith.constant 0 : i32
    %c0_i32_0 = arith.constant 0 : i32
    %c0_i32_1 = arith.constant 0 : i32
    return %c0_i32, %c0_i32_0 : i32, i32
  }
  func.func @transform_3(%arg0: i32) -> (i32, i32) {
    %c0_i32 = arith.constant 0 : i32
    %c0_i32_0 = arith.constant 0 : i32
    %c0_i32_1 = arith.constant 0 : i32
    return %c0_i32, %c0_i32_0 : i32, i32
  }
  func.func @transform_4(%arg0: i32) -> (i32, i32) {
    %c0_i32 = arith.constant 0 : i32
    %c0_i32_0 = arith.constant 0 : i32
    %c0_i32_1 = arith.constant 0 : i32
    return %c0_i32, %c0_i32_0 : i32, i32
  }
  func.func @transform_5(%arg0: i32) -> (i32, i32) {
    %c0_i32 = arith.constant 0 : i32
    %c0_i32_0 = arith.constant 0 : i32
    %c0_i32_1 = arith.constant 0 : i32
    return %c0_i32, %c0_i32_0 : i32, i32
  }
  func.func @transform_6(%arg0: i32) -> (i32, i32) {
    %c0_i32 = arith.constant 0 : i32
    %c0_i32_0 = arith.constant 0 : i32
    %c0_i32_1 = arith.constant 0 : i32
    return %c0_i32, %c0_i32_0 : i32, i32
  }
  func.func @transform_7(%arg0: i32) -> (i32, i32) {
    %c0_i32 = arith.constant 0 : i32
    %c0_i32_0 = arith.constant 0 : i32
    %c0_i32_1 = arith.constant 0 : i32
    return %c0_i32, %c0_i32_0 : i32, i32
  }
  func.func @transform_8(%arg0: i32) -> (i32, i32) {
    %c0_i32 = arith.constant 0 : i32
    %c0_i32_0 = arith.constant 0 : i32
    %c0_i32_1 = arith.constant 0 : i32
    return %c0_i32, %c0_i32_0 : i32, i32
  }
  func.func @transform_9(%arg0: i32) -> (i32, i32) {
    %c0_i32 = arith.constant 0 : i32
    %c0_i32_0 = arith.constant 0 : i32
    %c0_i32_1 = arith.constant 0 : i32
    return %c0_i32, %c0_i32_0 : i32, i32
  }
  func.func @transform_10(%arg0: i32) -> (i32, i32) {
    %c0_i32 = arith.constant 0 : i32
    %c0_i32_0 = arith.constant 0 : i32
    %c0_i32_1 = arith.constant 0 : i32
    return %c0_i32, %c0_i32_0 : i32, i32
  }
  func.func @transform_11(%arg0: i32) -> (i32, i32) {
    %c0_i32 = arith.constant 0 : i32
    %c0_i32_0 = arith.constant 0 : i32
    %c0_i32_1 = arith.constant 0 : i32
    return %c0_i32, %c0_i32_0 : i32, i32
  }
  func.func @transform_12(%arg0: i32) -> (i32, i32) {
    %c0_i32 = arith.constant 0 : i32
    %c0_i32_0 = arith.constant 0 : i32
    %c0_i32_1 = arith.constant 0 : i32
    return %c0_i32, %c0_i32_0 : i32, i32
  }
  func.func @transform_13(%arg0: i32) -> (i32, i32) {
    %c0_i32 = arith.constant 0 : i32
    %c0_i32_0 = arith.constant 0 : i32
    %c0_i32_1 = arith.constant 0 : i32
    return %c0_i32, %c0_i32_0 : i32, i32
  }
  func.func @transform_14(%arg0: i32) -> (i32, i32) {
    %c0_i32 = arith.constant 0 : i32
    %c0_i32_0 = arith.constant 0 : i32
    %c0_i32_1 = arith.constant 0 : i32
    return %c0_i32, %c0_i32_0 : i32, i32
  }
  func.func @transform_15(%arg0: i32) -> (i32, i32) {
    %c0_i32 = arith.constant 0 : i32
    %c0_i32_0 = arith.constant 0 : i32
    %c0_i32_1 = arith.constant 0 : i32
    return %c0_i32, %c0_i32_0 : i32, i32
  }
  func.func @transform_16(%arg0: i32) -> (i32, i32) {
    %c0_i32 = arith.constant 0 : i32
    %c0_i32_0 = arith.constant 0 : i32
    return %arg0, %c0_i32 : i32, i32
  }
}

</mosaic_0001>

<bundles_post_ra>
// kernel: tpu_custom_call.1
= control target key start
LH: loop header
LB: loop body
LE: loop exit
PB: predicated region body
PF: predicated region fallthrough
CT: control target
= control target key end

     0   :  { %s2441_s0 = inlined_call_operand.hbm [shape: f32[16,32], index: 0, kind: input, shape index: {}]   ;;  %s2442_s1 = inlined_call_operand.hbm [shape: f32[16,96], index: 1, kind: input, shape index: {}]   ;;  %s2443_s2 = inlined_call_operand.vmem [shape: f32[96,96], index: 2, kind: input, shape index: {}]   ;;  %s2444_s3 = inlined_call_operand.vmem [shape: f32[96,96], index: 3, kind: input, shape index: {}]   ;;  %s2445_s4 = inlined_call_operand.vmem [shape: f32[96,32], index: 4, kind: input, shape index: {}]   ;;  %s2446_s5 = inlined_call_operand.vmem [shape: f32[96,32], index: 5, kind: input, shape index: {}]   ;;  %s2447_s6 = inlined_call_operand.hbm [shape: f32[32,96], index: 6, kind: input, shape index: {}]   ;;  %s2448_s7 = inlined_call_operand.hbm [shape: f32[32,32], index: 7, kind: input, shape index: {}]   ;;  %s2449_s8 = inlined_call_operand.hbm [shape: f32[32,32], index: 8, kind: input, shape index: {}]   ;;  %s2450_s9 = inlined_call_operand.vmem [shape: f32[1,32], index: 9, kind: input, shape index: {}]   ;;  %s2451_s10 = inlined_call_operand.hbm [shape: f32[32,32], index: 10, kind: input, shape index: {}]   ;;  %s2452_s11 = inlined_call_operand.vmem [shape: f32[1,32], index: 11, kind: input, shape index: {}]   ;;  %s2453_s12 = inlined_call_operand.hbm [shape: f32[32,32], index: 12, kind: input, shape index: {}]   ;;  %s2454_s13 = inlined_call_operand.vmem [shape: f32[1,32], index: 13, kind: input, shape index: {}]   ;;  %s2455_s14 = inlined_call_operand.hbm [shape: f32[32,128], index: 14, kind: input, shape index: {}]   ;;  %s2456_s15 = inlined_call_operand.vmem [shape: f32[96,128], index: 15, kind: input, shape index: {}]   ;;  %s2457_s16 = inlined_call_operand.hbm [shape: f32[16,128], index: 16, kind: output, shape index: {}]  }
   0x1   :  { %2459 = sst [smem:[#allocation23_spill]] %s2441_s0 }
   0x2   :  { %21 = vsyncpa [#allocation3], 0 }
   0x3   :  { %22 = vsyncpa [#allocation6], 0 }
   0x4   :  { %23 = vsyncpa [#allocation9], 0 }
   0x5   :  { %24 = vsyncpa [#allocation12], 0 }
   0x6   :  { %25 = vsyncpa [#allocation15], 0 }
   0x7   :  { %26 = vsyncpa [#allocation4], 0  ;;  %s1957_s21 = smov [#allocation5]   ;;  %s1958_s23 = smov [#allocation8]  }
   0x8   :  { %s44_s22 = sshll.u32 %s1957_s21, 4  ;;  %s76_s24 = sshll.u32 %s1958_s23, 4  ;;  %s45_s22 = int_to_ptr.vmem [resolvable:$true] %s44_s22  ;;  %s2053_s24 = int_to_ptr.vmem [resolvable:$true] %s76_s24 }
   0x9   :  { %s1747_s27 = scalar_lea.hbm %s2442_s1, 256 }
   0xa   :  { %p1748_p0 = scmp.ne.s32.totalorder %s2442_s1, %s1747_s27  ;;  %p1751_p1 = scmp.lt.u32.totalorder %s1747_s27, %s2442_s1 }
   0xc   :  { %p1753_p2 = pnand %p1751_p1, %p1748_p0 }
   0xe   :  { %1756 = shalt.err (!%p1753_p2)
}
   0xf   :  { %s1757_s17 = scalar_lea.vmem %s45_s22, 256  ;;  %p1762_p4 = scmp.lt.s32.totalorder %s45_s22, %s45_s22 }
  0x10   :  { %p1758_p3 = scmp.ne.s32.totalorder %s45_s22, %s1757_s17  ;;  %p1763_p5 = scmp.lt.s32.totalorder %s1757_s17, %s1757_s17 }
  0x12   :  { %p1764_p6 = por %p1763_p5, %p1762_p4 }
  0x14   :  { %p1765_p7 = pnand %p1764_p6, %p1758_p3 }
  0x16   :  { %1768 = shalt.err (!%p1765_p7)
}
  0x17   :  { %s1959_s18 = smov 128   ;;  %s1960_s19 = smov 8  }
  0x18   :  { %50 = dma.hbm_to_vmem [thread:$0]  %s2442_s1, 256, %s45_s22, [#allocation6], %s1959_s18, %s1959_s18, %s1960_s19  }
  0x19   :  { %s1769_s26 = scalar_lea.hbm %s2448_s7, 512 }
  0x1a   :  { %p1770_p8 = scmp.ne.s32.totalorder %s2448_s7, %s1769_s26  ;;  %p1773_p9 = scmp.lt.u32.totalorder %s1769_s26, %s2448_s7 }
  0x1c   :  { %p1775_p10 = pnand %p1773_p9, %p1770_p8 }
  0x1e   :  { %1778 = shalt.err (!%p1775_p10)
}
  0x1f   :  { %s1779_s0 = scalar_lea.vmem %s2053_s24, 512  ;;  %p1784_p12 = scmp.lt.s32.totalorder %s2053_s24, %s2053_s24 }
  0x20   :  { %p1780_p11 = scmp.ne.s32.totalorder %s2053_s24, %s1779_s0  ;;  %p1785_p13 = scmp.lt.s32.totalorder %s1779_s0, %s1779_s0 }
  0x22   :  { %p1786_p0 = por %p1785_p13, %p1784_p12 }
  0x24   :  { %p1787_p1 = pnand %p1786_p0, %p1780_p11 }
  0x26   :  { %1790 = shalt.err (!%p1787_p1)
}
  0x27   :  { %82 = dma.hbm_to_vmem [thread:$0]  %s2448_s7, 512, %s2053_s24, [#allocation9], %s1959_s18, %s1959_s18, %s1960_s19  }
  0x28   :  { %s1961_s17 = smov [#allocation11]   ;;  %s1962_s21 = smov [#allocation2]  }
  0x29   :  { %s102_s20 = sshll.u32 %s1961_s17, 4  ;;  %s32_s23 = sshll.u32 %s1962_s21, 4  ;;  %s103_s20 = int_to_ptr.vmem [resolvable:$true] %s102_s20  ;;  %s2090_s23 = int_to_ptr.vmem [resolvable:$true] %s32_s23 }
  0x2a   :  { %s1791_s27 = scalar_lea.hbm %s2451_s10, 512 }
  0x2b   :  { %p1792_p2 = scmp.ne.s32.totalorder %s2451_s10, %s1791_s27  ;;  %p1795_p3 = scmp.lt.u32.totalorder %s1791_s27, %s2451_s10 }
  0x2d   :  { %p1797_p4 = pnand %p1795_p3, %p1792_p2 }
  0x2f   :  { %1800 = shalt.err (!%p1797_p4)
}
  0x30   :  { %s1801_s7 = scalar_lea.vmem %s103_s20, 512  ;;  %p1806_p6 = scmp.lt.s32.totalorder %s103_s20, %s103_s20 }
  0x31   :  { %p1802_p5 = scmp.ne.s32.totalorder %s103_s20, %s1801_s7  ;;  %p1807_p7 = scmp.lt.s32.totalorder %s1801_s7, %s1801_s7 }
  0x33   :  { %p1808_p8 = por %p1807_p7, %p1806_p6 }
  0x35   :  { %p1809_p9 = pnand %p1808_p8, %p1802_p5 }
  0x37   :  { %1812 = shalt.err (!%p1809_p9)
}
  0x38   :  { %108 = dma.hbm_to_vmem [thread:$0]  %s2451_s10, 512, %s103_s20, [#allocation12], %s1959_s18, %s1959_s18, %s1960_s19  }
  0x39   :  { %s2460_s21 = sld [smem:[#allocation23_spill]] }
  0x3f   :  { %s1813_s25 = scalar_lea.hbm %s2460_s21, 256 }
  0x40   :  { %p1814_p10 = scmp.ne.s32.totalorder %s2460_s21, %s1813_s25  ;;  %p1817_p11 = scmp.lt.u32.totalorder %s1813_s25, %s2460_s21 }
  0x42   :  { %p1819_p12 = pnand %p1817_p11, %p1814_p10 }
  0x44   :  { %1822 = shalt.err (!%p1819_p12)
}
  0x45   :  { %s1823_s30 = scalar_lea.vmem %s2090_s23, 256  ;;  %p1828_p0 = scmp.lt.s32.totalorder %s2090_s23, %s2090_s23 }
  0x46   :  { %p1824_p13 = scmp.ne.s32.totalorder %s2090_s23, %s1823_s30  ;;  %p1829_p1 = scmp.lt.s32.totalorder %s1823_s30, %s1823_s30 }
  0x48   :  { %p1830_p2 = por %p1829_p1, %p1828_p0 }
  0x4a   :  { %p1831_p3 = pnand %p1830_p2, %p1824_p13 }
  0x4c   :  { %1834 = shalt.err (!%p1831_p3)
}
  0x4d   :  { %38 = dma.hbm_to_vmem [thread:$0]  %s2460_s21, 256, %s2090_s23, [#allocation3], %s1959_s18, %s1959_s18, %s1960_s19  }
  0x4e   :  { %s1963_s0 = smov [#allocation7]   ;;  %s1964_s24 = smov [#allocation10]  }
  0x4f   :  { %s64_s7 = sshll.u32 %s1963_s0, 4  ;;  %s88_s1 = sshll.u32 %s1964_s24, 4  ;;  %s65_s7 = int_to_ptr.vmem [resolvable:$true] %s64_s7  ;;  %s2127_s1 = int_to_ptr.vmem [resolvable:$true] %s88_s1 }
  0x50   :  { %s1835_s25 = scalar_lea.hbm %s2447_s6, 512 }
  0x51   :  { %p1836_p4 = scmp.ne.s32.totalorder %s2447_s6, %s1835_s25  ;;  %p1839_p5 = scmp.lt.u32.totalorder %s1835_s25, %s2447_s6 }
  0x53   :  { %p1841_p6 = pnand %p1839_p5, %p1836_p4 }
  0x55   :  { %1844 = shalt.err (!%p1841_p6)
}
  0x56   :  { %s1845_s23 = scalar_lea.vmem %s65_s7, 512  ;;  %p1850_p8 = scmp.lt.s32.totalorder %s65_s7, %s65_s7 }
  0x57   :  { %p1846_p7 = scmp.ne.s32.totalorder %s65_s7, %s1845_s23  ;;  %p1851_p9 = scmp.lt.s32.totalorder %s1845_s23, %s1845_s23 }
  0x59   :  { %p1852_p10 = por %p1851_p9, %p1850_p8 }
  0x5b   :  { %p1853_p11 = pnand %p1852_p10, %p1846_p7 }
  0x5d   :  { %1856 = shalt.err (!%p1853_p11)
}
  0x5e   :  { %70 = dma.hbm_to_vmem [thread:$0]  %s2447_s6, 512, %s65_s7, [#allocation6], %s1959_s18, %s1959_s18, %s1960_s19  }
  0x5f   :  { %s1857_s0 = scalar_lea.hbm %s2449_s8, 512 }
  0x60   :  { %p1858_p12 = scmp.ne.s32.totalorder %s2449_s8, %s1857_s0  ;;  %p1861_p13 = scmp.lt.u32.totalorder %s1857_s0, %s2449_s8 }
  0x62   :  { %p1863_p0 = pnand %p1861_p13, %p1858_p12 }
  0x64   :  { %1866 = shalt.err (!%p1863_p0)
}
  0x65   :  { %s1867_s26 = scalar_lea.vmem %s2127_s1, 512  ;;  %p1872_p2 = scmp.lt.s32.totalorder %s2127_s1, %s2127_s1 }
  0x66   :  { %p1868_p1 = scmp.ne.s32.totalorder %s2127_s1, %s1867_s26  ;;  %p1873_p3 = scmp.lt.s32.totalorder %s1867_s26, %s1867_s26 }
  0x68   :  { %p1874_p4 = por %p1873_p3, %p1872_p2 }
  0x6a   :  { %p1875_p5 = pnand %p1874_p4, %p1868_p1 }
  0x6c   :  { %1878 = shalt.err (!%p1875_p5)
}
  0x6d   :  { %94 = dma.hbm_to_vmem [thread:$0]  %s2449_s8, 512, %s2127_s1, [#allocation9], %s1959_s18, %s1959_s18, %s1960_s19  }
  0x6e   :  { %s1965_s27 = smov [#allocation13]   ;;  %s1966_s29 = smov [#allocation14]  }
  0x6f   :  { %s116_s28 = sshll.u32 %s1965_s27, 4  ;;  %s130_s23 = sshll.u32 %s1966_s29, 4  ;;  %s117_s28 = int_to_ptr.vmem [resolvable:$true] %s116_s28  ;;  %s2164_s23 = int_to_ptr.vmem [resolvable:$true] %s130_s23 }
  0x70   :  { %s1879_s10 = scalar_lea.hbm %s2453_s12, 512 }
  0x71   :  { %p1880_p6 = scmp.ne.s32.totalorder %s2453_s12, %s1879_s10  ;;  %p1883_p7 = scmp.lt.u32.totalorder %s1879_s10, %s2453_s12 }
  0x73   :  { %p1885_p8 = pnand %p1883_p7, %p1880_p6 }
  0x75   :  { %1888 = shalt.err (!%p1885_p8)
}
  0x76   :  { %s1889_s8 = scalar_lea.vmem %s117_s28, 512  ;;  %p1894_p10 = scmp.lt.s32.totalorder %s117_s28, %s117_s28 }
  0x77   :  { %p1890_p9 = scmp.ne.s32.totalorder %s117_s28, %s1889_s8  ;;  %p1895_p11 = scmp.lt.s32.totalorder %s1889_s8, %s1889_s8 }
  0x79   :  { %p1896_p12 = por %p1895_p11, %p1894_p10 }
  0x7b   :  { %p1897_p13 = pnand %p1896_p12, %p1890_p9 }
  0x7d   :  { %1900 = shalt.err (!%p1897_p13)
}
  0x7e   :  { %122 = dma.hbm_to_vmem [thread:$0]  %s2453_s12, 512, %s117_s28, [#allocation12], %s1959_s18, %s1959_s18, %s1960_s19  }
  0x7f   :  { %s1901_s6 = scalar_lea.hbm %s2455_s14, 512 }
  0x80   :  { %p1902_p0 = scmp.ne.s32.totalorder %s2455_s14, %s1901_s6  ;;  %p1905_p1 = scmp.lt.u32.totalorder %s1901_s6, %s2455_s14 }
  0x82   :  { %p1907_p2 = pnand %p1905_p1, %p1902_p0 }
  0x84   :  { %1910 = shalt.err (!%p1907_p2)
}
  0x85   :  { %s1911_s30 = scalar_lea.vmem %s2164_s23, 512  ;;  %p1916_p4 = scmp.lt.s32.totalorder %s2164_s23, %s2164_s23 }
  0x86   :  { %p1912_p3 = scmp.ne.s32.totalorder %s2164_s23, %s1911_s30  ;;  %p1917_p5 = scmp.lt.s32.totalorder %s1911_s30, %s1911_s30 }
  0x88   :  { %p1918_p6 = por %p1917_p5, %p1916_p4 }
  0x8a   :  { %p1919_p7 = pnand %p1918_p6, %p1912_p3 }
  0x8c   :  { %1922 = shalt.err (!%p1919_p7)
}
  0x8d   :  { %136 = dma.hbm_to_vmem [thread:$0]  %s2455_s14, 512, %s2164_s23, [#allocation15], %s1959_s18, %s1959_s18, %s1960_s19  }
  0x8e   :  { %1945 = dma.done.wait [#allocation3], 256  }
  0x8f   :  { %1946 = vsyncadd [#allocation3], 4294967040 }
  0x90   :  { %1947 = dma.done.wait [#allocation6], 768  }
  0x91   :  { %1948 = vsyncadd [#allocation6], 4294966528 }
  0x92   :  { %1949 = dma.done.wait [#allocation9], 1024  }
  0x93   :  { %1950 = vsyncadd [#allocation9], 4294966272 }
  0x94   :  { %1951 = dma.done.wait [#allocation12], 1024  }
  0x95   :  { %1952 = vsyncadd [#allocation12], 4294966272 }
  0x96   :  { %1953 = dma.done.wait [#allocation15], 512  }
  0x97   :  { %1954 = vsyncadd [#allocation15], 4294966784  ;;  %v167_v0 = vld [vmem:[%s2443_s2] sm:$0xff]  ;;  %v168_v1 = vld [vmem:[%s2443_s2 + $0x8] sm:$0xff]  ;;  %vm179_vm0 = vcmask 785408   ;;  %vm560_vm3 = vcmask 261120  }
  0x98   :  { %v261_v2 = vld [vmem:[%s2444_s3] sm:$0xff]  ;;  %v1548_v3 = vpack.c.bf16 %v168_v1, %v167_v0  ;;  %v262_v4 = vld [vmem:[%s2444_s3 + $0x8] sm:$0xff]  ;;  %v169_v5 = vld [vmem:[%s2443_s2 + $0x10] sm:$0xff] }
  0x99   :  { %v170_v6 = vld [vmem:[%s2443_s2 + $0x18] sm:$0xff]  ;;  %v1572_v7 = vpack.c.bf16 %v262_v4, %v261_v2  ;;  %v263_v9 = vld [vmem:[%s2444_s3 + $0x10] sm:$0xff]  ;;  %v171_v11 = vld [vmem:[%s2443_s2 + $0x20] sm:$0xff] }
  0x9a   :  { %v1552_v8 = vpack.c.bf16 %v170_v6, %v169_v5  ;;  %v264_v10 = vld [vmem:[%s2444_s3 + $0x18] sm:$0xff]  ;;  %1549 = vmatprep.subr.bf16.mxu0 %v1548_v3  ;;  %v172_v13 = vld [vmem:[%s2443_s2 + $0x28] sm:$0xff]  ;;  %v265_v14 = vld [vmem:[%s2444_s3 + $0x20] sm:$0xff] }
  0x9b   :  { %v1576_v12 = vpack.c.bf16 %v264_v10, %v263_v9  ;;  %v266_v15 = vld [vmem:[%s2444_s3 + $0x28] sm:$0xff]  ;;  %1573 = vmatprep.subr.bf16.mxu1 %v1572_v7  ;;  %1551 = vmatpush3.bf16.msra.mxu0 %v1548_v3  ;;  %v1556_v16 = vpack.c.bf16 %v172_v13, %v171_v11  ;;  %v173_v18 = vld [vmem:[%s2443_s2 + $0x30] sm:$0xff]  ;;  %v174_v19 = vld [vmem:[%s2443_s2 + $0x38] sm:$0xff] }
  0x9c   :  { %1575 = vmatpush3.bf16.msra.mxu1 %v1572_v7  ;;  %1553 = vmatprep.subr.bf16.mxu0 %v1552_v8  ;;  %v1580_v17 = vpack.c.bf16 %v266_v15, %v265_v14  ;;  %v267_v20 = vld [vmem:[%s2444_s3 + $0x30] sm:$0xff]  ;;  %v268_v21 = vld [vmem:[%s2444_s3 + $0x38] sm:$0xff]  ;;  %v1560_v23 = vpack.c.bf16 %v174_v19, %v173_v18  ;;  %v175_v25 = vld [vmem:[%s2443_s2 + $0x40] sm:$0xff] }
  0x9d   :  { %1577 = vmatprep.subr.bf16.mxu1 %v1576_v12  ;;  %v165_v22 = vld [vmem:[#allocation5] sm:$0xff]  ;;  %v1584_v24 = vpack.c.bf16 %v268_v21, %v267_v20  ;;  %v176_v26 = vld [vmem:[%s2443_s2 + $0x48] sm:$0xff]  ;;  %v269_v27 = vld [vmem:[%s2444_s3 + $0x40] sm:$0xff] }
  0x9e   :  { %1371 = vmatprep.mubr.msk.f32.mxu0 %vm179_vm0, %v165_v22  ;;  %v270_v28 = vld [vmem:[%s2444_s3 + $0x48] sm:$0xff]  ;;  %1398 = vmatprep.mubr.msk.f32.mxu1 %vm179_vm0, %v165_v22  ;;  %v1564_v29 = vpack.c.bf16 %v176_v26, %v175_v25  ;;  %v177_v31 = vld [vmem:[%s2443_s2 + $0x50] sm:$0xff]  ;;  %v178_v32 = vld [vmem:[%s2443_s2 + $0x58] sm:$0xff] }
  0x9f   :  { %1555 = vmatpush3.bf16.msra.mxu0 %v1552_v8  ;;  %v1588_v30 = vpack.c.bf16 %v270_v28, %v269_v27  ;;  %v271_v33 = vld [vmem:[%s2444_s3 + $0x50] sm:$0xff]  ;;  %v272_v34 = vld [vmem:[%s2444_s3 + $0x58] sm:$0xff]  ;;  %v1568_v35 = vpack.c.bf16 %v178_v32, %v177_v31  ;;  %v350_v37 = vld [vmem:[%s2445_s4] sm:$0xff] }
  0xa0   :  { %1579 = vmatpush3.bf16.msra.mxu1 %v1576_v12  ;;  %1557 = vmatprep.subr.bf16.mxu0 %v1556_v16  ;;  %v1592_v36 = vpack.c.bf16 %v272_v34, %v271_v33  ;;  %v351_v38 = vld [vmem:[%s2445_s4 + $0x8] sm:$0xff]  ;;  %v459_v39 = vld [vmem:[%s2446_s5] sm:$0xff]  ;;  %v352_v43 = vld [vmem:[%s2445_s4 + $0x10] sm:$0xff] }
  0xa1   :  { %1581 = vmatprep.subr.bf16.mxu1 %v1580_v17  ;;  %v460_v40 = vld [vmem:[%s2446_s5 + $0x8] sm:$0xff]  ;;  %v1596_v41 = vpack.c.bf16 %v351_v38, %v350_v37  ;;  %v353_v44 = vld [vmem:[%s2445_s4 + $0x18] sm:$0xff]  ;;  %v461_v45 = vld [vmem:[%s2446_s5 + $0x10] sm:$0xff] }
  0xa2   :  { %v1620_v42 = vpack.c.bf16 %v460_v40, %v459_v39  ;;  %v462_v46 = vld [vmem:[%s2446_s5 + $0x18] sm:$0xff]  ;;  %v1600_v48 = vpack.c.bf16 %v353_v44, %v352_v43  ;;  %v354_v50 = vld [vmem:[%s2445_s4 + $0x20] sm:$0xff]  ;;  %v355_v51 = vld [vmem:[%s2445_s4 + $0x28] sm:$0xff] }
  0xa3   :  { %1559 = vmatpush3.bf16.msra.mxu0 %v1556_v16  ;;  %v166_v47 = vld [vmem:[#allocation5 + $0x8] sm:$0xff]  ;;  %v1624_v49 = vpack.c.bf16 %v462_v46, %v461_v45  ;;  %v463_v52 = vld [vmem:[%s2446_s5 + $0x20] sm:$0xff]  ;;  %v464_v53 = vld [vmem:[%s2446_s5 + $0x28] sm:$0xff]  ;;  %v1604_v54 = vpack.c.bf16 %v355_v51, %v354_v50 }
  0xa4   :  { %1583 = vmatpush3.bf16.msra.mxu1 %v1580_v17  ;;  %1561 = vmatprep.subr.bf16.mxu0 %v1560_v23  ;;  %v1628_v55 = vpack.c.bf16 %v464_v53, %v463_v52  ;;  %v356_v56 = vld [vmem:[%s2445_s4 + $0x30] sm:$0xff]  ;;  %v357_v57 = vld [vmem:[%s2445_s4 + $0x38] sm:$0xff]  ;;  %v358_v62 = vld [vmem:[%s2445_s4 + $0x40] sm:$0xff] }
  0xa5   :  { %1585 = vmatprep.subr.bf16.mxu1 %v1584_v24  ;;  %v465_v58 = vld [vmem:[%s2446_s5 + $0x30] sm:$0xff]  ;;  %v466_v59 = vld [vmem:[%s2446_s5 + $0x38] sm:$0xff]  ;;  %v1608_v60 = vpack.c.bf16 %v357_v57, %v356_v56  ;;  %v359_v63 = vld [vmem:[%s2445_s4 + $0x48] sm:$0xff] }
  0xa6   :  { %v1632_v61 = vpack.c.bf16 %v466_v59, %v465_v58  ;;  %v467_v0 = vld [vmem:[%s2446_s5 + $0x40] sm:$0xff]  ;;  %v468_v1 = vld [vmem:[%s2446_s5 + $0x48] sm:$0xff]  ;;  %v1612_v2 = vpack.c.bf16 %v359_v63, %v358_v62  ;;  %v360_v4 = vld [vmem:[%s2445_s4 + $0x50] sm:$0xff] }
  0xa7   :  { %1563 = vmatpush3.bf16.msra.mxu0 %v1560_v23  ;;  %v1636_v3 = vpack.c.bf16 %v468_v1, %v467_v0  ;;  %v361_v5 = vld [vmem:[%s2445_s4 + $0x58] sm:$0xff]  ;;  %v469_v6 = vld [vmem:[%s2446_s5 + $0x50] sm:$0xff]  ;;  %v556_v18 = vld [vmem:[#allocation10] sm:$0xff] }
  0xa8   :  { %1587 = vmatpush3.bf16.msra.mxu1 %v1584_v24  ;;  %1565 = vmatprep.subr.bf16.mxu0 %v1564_v29  ;;  %v1616_v7 = vpack.c.bf16 %v361_v5, %v360_v4  ;;  %v470_v8 = vld [vmem:[%s2446_s5 + $0x58] sm:$0xff]  ;;  %v557_v19 = vld [vmem:[#allocation10 + $0x8] sm:$0xff]  ;;  %v558_v21 = vld [vmem:[#allocation10 + $0x10] sm:$0xff] }
  0xa9   :  { %1589 = vmatprep.subr.bf16.mxu1 %v1588_v30  ;;  %v1640_v9 = vpack.c.bf16 %v470_v8, %v469_v6  ;;  %v1644_v20 = vpack.c.bf16 %v557_v19, %v556_v18  ;;  %v559_v22 = vld [vmem:[#allocation10 + $0x18] sm:$0xff]  ;;  %v552_v24 = vld [vmem:[#allocation8] sm:$0xff]  ;;  %v553_v25 = vld [vmem:[#allocation8 + $0x8] sm:$0xff] }
  0xaa   :  { %v1648_v23 = vpack.c.bf16 %v559_v22, %v558_v21  ;;  %v1652_v26 = vpack.c.bf16 %v553_v25, %v552_v24  ;;  %v163_v43 = vld [vmem:[#allocation2] sm:$0xff]  ;;  %v164_v45 = vld [vmem:[#allocation2 + $0x8] sm:$0xff]  ;;  %v748_v52 = vld [vmem:[#allocation11 + $0x10] sm:$0xff] }
  0xab   :  { %1567 = vmatpush3.bf16.msra.mxu0 %v1564_v29  ;;  %v746_v46 = vld [vmem:[#allocation11] sm:$0xff]  ;;  %v841_v50 = vld [vmem:[#allocation13 + $0x8] sm:$0xff]  ;;  %v749_v53 = vld [vmem:[#allocation11 + $0x18] sm:$0xff] }
  0xac   :  { %1591 = vmatpush3.bf16.msra.mxu1 %v1588_v30  ;;  %1569 = vmatprep.subr.bf16.mxu0 %v1568_v35  ;;  %v843_v56 = vld [vmem:[#allocation13 + $0x18] sm:$0xff]  ;;  %v926_v58 = vld [vmem:[#allocation7] sm:$0xff]  ;;  %v927_v59 = vld [vmem:[#allocation7 + $0x8] sm:$0xff] }
  0xad   :  { %1593 = vmatprep.subr.bf16.mxu1 %v1592_v36  ;;  %v1018_v18 = vld [vmem:[%s2456_s15 + $0x8] sm:$0xff]  ;;  %v1019_v19 = vld [vmem:[%s2456_s15 + $0x10] sm:$0xff]  ;;  %v1020_v21 = vld [vmem:[%s2456_s15 + $0x18] sm:$0xff] }
  0xae   :  { %v1688_v22 = vpack.c.bf16 %v1020_v21, %v1019_v19  ;;  %v1022_v24 = vld [vmem:[%s2456_s15 + $0x28] sm:$0xff] }
  0xaf   :  { %1571 = vmatpush3.bf16.msra.mxu0 %v1568_v35  ;;  %v554_v35 = vld [vmem:[#allocation8 + $0x10] sm:$0xff] }
  0xb0   :  { %1595 = vmatpush3.bf16.msra.mxu1 %v1592_v36  ;;  %1597 = vmatprep.subr.bf16.mxu0 %v1596_v41  ;;  %v555_v36 = vld [vmem:[#allocation8 + $0x18] sm:$0xff] }
  0xb1   :  { %1621 = vmatprep.subr.bf16.mxu1 %v1620_v42 }
  0xb2   :  { %1372 = vmatmul.mubr.msk.f32.vlgmr.msra.gmra.mrb[0].mxu0 %vm179_vm0, %v166_v47 }
  0xb3   :  { %1399 = vmatmul.mubr.msk.f32.vlgmr.msra.gmra.mrb[0].mxu1 %vm179_vm0, %v166_v47  ;;  %1599 = vmatpush3.bf16.msra.mxu0 %v1596_v41  ;;  %v747_v47 = vld [vmem:[#allocation11 + $0x8] sm:$0xff] }
  0xb4   :  { %1623 = vmatpush3.bf16.msra.mxu1 %v1620_v42  ;;  %1601 = vmatprep.subr.bf16.mxu0 %v1600_v48  ;;  %v1656_v42 = vpack.c.bf16 %v555_v36, %v554_v35 }
  0xb5   :  { %1625 = vmatprep.subr.bf16.mxu1 %v1624_v49 }
  0xb7   :  { %1603 = vmatpush3.bf16.msra.mxu0 %v1600_v48  ;;  %v840_v48 = vld [vmem:[#allocation13] sm:$0xff] }
  0xb8   :  { %1627 = vmatpush3.bf16.msra.mxu1 %v1624_v49  ;;  %1605 = vmatprep.subr.bf16.mxu0 %v1604_v54  ;;  %v1660_v49 = vpack.c.bf16 %v747_v47, %v746_v46  ;;  %v1668_v51 = vpack.c.bf16 %v841_v50, %v840_v48  ;;  %v1014_v46 = vld [vmem:[#allocation14 + $0x8] sm:$0xff]  ;;  %v1015_v48 = vld [vmem:[#allocation14 + $0x10] sm:$0xff]  ;;  %v1229_v50 = vld [vmem:[%s2452_s11] ss:$0 sm:$0xff]  ;;  %s1967_s11 = smov [#allocation16]  }
  0xb9   :  { %1629 = vmatprep.subr.bf16.mxu1 %v1628_v55 }
  0xbb   :  { %1607 = vmatpush3.bf16.msra.mxu0 %v1604_v54  ;;  %v842_v54 = vld [vmem:[#allocation13 + $0x10] sm:$0xff] }
  0xbc   :  { %1631 = vmatpush3.bf16.msra.mxu1 %v1628_v55  ;;  %1609 = vmatprep.subr.bf16.mxu0 %v1608_v60  ;;  %v1664_v55 = vpack.c.bf16 %v749_v53, %v748_v52  ;;  %v1672_v57 = vpack.c.bf16 %v843_v56, %v842_v54 }
  0xbd   :  { %1633 = vmatprep.subr.bf16.mxu1 %v1632_v61 }
  0xbf   :  { %1611 = vmatpush3.bf16.msra.mxu0 %v1608_v60  ;;  %v1676_v60 = vpack.c.bf16 %v927_v59, %v926_v58 }
  0xc0   :  { %1635 = vmatpush3.bf16.msra.mxu1 %v1632_v61  ;;  %1613 = vmatprep.subr.bf16.mxu0 %v1612_v2  ;;  %v1226_v61 = vld [vmem:[%s2450_s9] ss:$0 sm:$0xff] }
  0xc1   :  { %1637 = vmatprep.subr.bf16.mxu1 %v1636_v3 }
  0xc3   :  { %1615 = vmatpush3.bf16.msra.mxu0 %v1612_v2 }
  0xc4   :  { %1639 = vmatpush3.bf16.msra.mxu1 %v1636_v3  ;;  %1617 = vmatprep.subr.bf16.mxu0 %v1616_v7 }
  0xc5   :  { %1641 = vmatprep.subr.bf16.mxu1 %v1640_v9 }
  0xc7   :  { %1619 = vmatpush3.bf16.msra.mxu0 %v1616_v7 }
  0xc8   :  { %1643 = vmatpush3.bf16.msra.mxu1 %v1640_v9  ;;  %1645 = vmatprep.subr.bf16.mxu0 %v1644_v20 }
  0xc9   :  { %1669 = vmatprep.subr.bf16.mxu1 %v1668_v51 }
 0x185   :  { %v1373_v10 = vpop.f32.mrb[0].mxu0 }
 0x186   :  { %v2349_v11 = vpop.f32.mrb[0].mxu1  ;;  %v252_v12 = vpop.f32.mrb[1].mxu0  ;;  %v349_v16 = vmul.f32 %v1373_v10, %v1373_v10 }
 0x187   :  { %v458_v13 = vmul.f32 %v2349_v11, %v1373_v10  ;;  %v348_v14 = vmul.f32 %v252_v12, %v252_v12  ;;  %v2352_v15 = vpop.f32.mrb[1].mxu1 }
 0x188   :  { %v457_v17 = vmul.f32 %v2352_v15, %v252_v12 }
 0x189   :  { %1425 = vmatprep.mubr.msk.f32.mxu0 %vm179_vm0, %v348_v14  ;;  %v929_v14 = vld [vmem:[#allocation7 + $0x18] sm:$0xff] }
 0x18a   :  { %1452 = vmatprep.mubr.msk.f32.mxu1 %vm179_vm0, %v457_v17  ;;  %1426 = vmatmul.mubr.msk.f32.vlgmr.msra.gmra.mrb[2].mxu0 %vm179_vm0, %v349_v16  ;;  %v1017_v17 = vld [vmem:[%s2456_s15] sm:$0xff] }
 0x18b   :  { %1453 = vmatmul.mubr.msk.f32.vlgmr.msra.gmra.mrb[2].mxu1 %vm179_vm0, %v458_v13  ;;  %1647 = vmatpush3.bf16.msra.mxu0 %v1644_v20  ;;  %v928_v13 = vld [vmem:[#allocation7 + $0x10] sm:$0xff]  ;;  %v1684_v20 = vpack.c.bf16 %v1018_v18, %v1017_v17 }
 0x18c   :  { %1649 = vmatprep.subr.bf16.mxu0 %v1648_v23  ;;  %1671 = vmatpush3.bf16.msra.mxu1 %v1668_v51  ;;  %v1680_v16 = vpack.c.bf16 %v929_v14, %v928_v13 }
 0x18d   :  { %1673 = vmatprep.subr.bf16.mxu1 %v1672_v57 }
 0x18f   :  { %1651 = vmatpush3.bf16.msra.mxu0 %v1648_v23  ;;  %v1021_v23 = vld [vmem:[%s2456_s15 + $0x20] sm:$0xff] }
 0x190   :  { %1653 = vmatprep.subr.bf16.mxu0 %v1652_v26  ;;  %1675 = vmatpush3.bf16.msra.mxu1 %v1672_v57  ;;  %v1692_v25 = vpack.c.bf16 %v1022_v24, %v1021_v23 }
 0x191   :  { %1685 = vmatprep.subr.bf16.mxu1 %v1684_v20 }
 0x25d   :  { %v1427_v27 = vpop.f32.mrb[2].mxu0 }
 0x25e   :  { %1735 = vrsqrt.f32 %v1427_v27  ;;  %v2359_v28 = vpop.f32.mrb[2].mxu1  ;;  %v434_v29 = vpop.f32.mrb[3].mxu0  ;;  %vm452_vm1 = vcmp.eq.f32.partialorder %v1427_v27, inf  ;;  %v455_v40 = vand.u32 2147483648, %v1427_v27  ;;  %vm454_vm5 = vcmp.eq.f32.partialorder %v1427_v27, 0.0 }
 0x25f   :  { %1737 = vrsqrt.f32 %v434_v29  ;;  %v2361_v30 = vpop.f32.mrb[3].mxu1  ;;  %vm445_vm2 = vcmp.eq.f32.partialorder %v434_v29, inf  ;;  %v448_v37 = vand.u32 2147483648, %v434_v29  ;;  %vm447_vm4 = vcmp.eq.f32.partialorder %v434_v29, 0.0 }
 0x268   :  { %v1736_v31 = vpop.eup %1735 }
 0x269   :  { %v1738_v32 = vpop.eup %1737  ;;  %v451_v33 = vmul.f32 %v1736_v31, %v1427_v27  ;;  %v1025_v31 = vld [vmem:[%s2456_s15 + $0x40] sm:$0xff] }
 0x26a   :  { %v444_v34 = vmul.f32 %v1738_v32, %v434_v29  ;;  %v1026_v32 = vld [vmem:[%s2456_s15 + $0x48] sm:$0xff] }
 0x26b   :  { %v453_v38 = vsel %vm452_vm1, %v1427_v27, %v451_v33  ;;  %v1024_v27 = vld [vmem:[%s2456_s15 + $0x38] sm:$0xff]  ;;  %v1700_v33 = vpack.c.bf16 %v1026_v32, %v1025_v31 }
 0x26c   :  { %v446_v39 = vsel %vm445_vm2, %v434_v29, %v444_v34  ;;  %v456_v44 = vsel %vm454_vm5, %v455_v40, %v453_v38  ;;  %v1232_v34 = vld [vmem:[%s2454_s13] ss:$0 sm:$0xff] }
 0x26d   :  { %v449_v41 = vsel %vm447_vm4, %v448_v37, %v446_v39 }
 0x26e   :  { %1463 = vmatprep.mubr.msk.f32.mxu0 %vm560_vm3, %v449_v41 }
 0x26f   :  { %1464 = vmatmul.mubr.msk.f32.vlgmr.msra.gmra.mrb[4].mxu0 %vm560_vm3, %v456_v44  ;;  %v1028_v44 = vld [vmem:[%s2456_s15 + $0x58] sm:$0xff] }
 0x270   :  { %1655 = vmatpush3.bf16.msra.mxu0 %v1652_v26  ;;  %1474 = vmatprep.mubr.msk.f32.mxu0 %vm560_vm3, %v163_v43  ;;  %v1023_v26 = vld [vmem:[%s2456_s15 + $0x30] sm:$0xff] }
 0x271   :  { %1657 = vmatprep.subr.bf16.mxu0 %v1656_v42  ;;  %v1696_v29 = vpack.c.bf16 %v1024_v27, %v1023_v26  ;;  %v1027_v43 = vld [vmem:[%s2456_s15 + $0x50] sm:$0xff]  ;;  %s1198_s15 = sshll.u32 %s1967_s11, 4  ;;  %s1199_s15 = int_to_ptr.vmem [resolvable:$true] %s1198_s15 }
 0x272   :  { %s1923_s6 = scalar_lea.vmem %s1199_s15, 256  ;;  %p1928_p9 = scmp.lt.s32.totalorder %s1199_s15, %s1199_s15 }
 0x273   :  { %p1924_p8 = scmp.ne.s32.totalorder %s1199_s15, %s1923_s6  ;;  %p1929_p10 = scmp.lt.s32.totalorder %s1923_s6, %s1923_s6 }
 0x274   :  { %1659 = vmatpush3.bf16.msra.mxu0 %v1656_v42 }
 0x275   :  { %1661 = vmatprep.subr.bf16.mxu0 %v1660_v49  ;;  %p1930_p11 = por %p1929_p10, %p1928_p9 }
 0x277   :  { %1475 = vmatmul.mubr.msk.f32.vlgmr.msra.gmra.mrb[4].mxu0 %vm560_vm3, %v164_v45  ;;  %v1704_v45 = vpack.c.bf16 %v1028_v44, %v1027_v43  ;;  %p1931_p12 = pnand %p1930_p11, %p1924_p8 }
 0x278   :  { %1663 = vmatpush3.bf16.msra.mxu0 %v1660_v49  ;;  %v1016_v49 = vld [vmem:[#allocation14 + $0x18] sm:$0xff] }
 0x279   :  { %1665 = vmatprep.subr.bf16.mxu0 %v1664_v55  ;;  %v1712_v54 = vpack.c.bf16 %v1016_v49, %v1015_v48 }
 0x27c   :  { %1667 = vmatpush3.bf16.msra.mxu0 %v1664_v55 }
 0x27d   :  { %1677 = vmatprep.subr.bf16.mxu0 %v1676_v60 }
 0x34a   :  { %v1476_v62 = vpop.f32.mrb[4].mxu0 }
 0x34b   :  { %v731_v63 = vadd.f32 %v1476_v62, %v1226_v61  ;;  %v714_v0 = vpop.f32.mrb[5].mxu0 }
 0x34c   :  { %v730_v1 = vadd.f32 %v1226_v61, %v714_v0 }
 0x34d   :  { %v1228_v2 = vmul.f32 -1.442695, %v731_v63 }
 0x34e   :  { %v1227_v3 = vmul.f32 -1.442695, %v730_v1 }
 0x34f   :  { %1739 = vpow2.f32 %v1228_v2 }
 0x350   :  { %1741 = vpow2.f32 %v1227_v3 }
 0x359   :  { %v1740_v4 = vpop.eup %1739 }
 0x35a   :  { %v1742_v5 = vpop.eup %1741  ;;  %v739_v6 = vadd.f32 1.0, %v1740_v4 }
 0x35b   :  { %v738_v7 = vadd.f32 1.0, %v1742_v5 }
 0x35c   :  { %1743 = vrcp.f32 %v739_v6 }
 0x35d   :  { %1745 = vrcp.f32 %v738_v7 }
 0x366   :  { %v1744_v8 = vpop.eup %1743 }
 0x367   :  { %v1746_v9 = vpop.eup %1745  ;;  %v745_v12 = vmul.f32 %v1744_v8, %v731_v63 }
 0x368   :  { %v744_v10 = vmul.f32 %v1746_v9, %v730_v1 }
 0x36a   :  { %1485 = vmatprep.mubr.msk.f32.mxu0 %vm560_vm3, %v744_v10  ;;  %1496 = vmatprep.mubr.msk.f32.mxu1 %vm560_vm3, %v744_v10 }
 0x36b   :  { %1486 = vmatmul.mubr.msk.f32.vlgmr.msra.gmra.mrb[6].mxu0 %vm560_vm3, %v745_v12  ;;  %1497 = vmatmul.mubr.msk.f32.vlgmr.msra.gmra.mrb[4].mxu1 %vm560_vm3, %v745_v12 }
 0x36c   :  { %1679 = vmatpush3.bf16.msra.mxu0 %v1676_v60  ;;  %1687 = vmatpush3.bf16.msra.mxu1 %v1684_v20 }
 0x36d   :  { %1681 = vmatprep.subr.bf16.mxu0 %v1680_v16  ;;  %1689 = vmatprep.subr.bf16.mxu1 %v1688_v22 }
 0x370   :  { %1683 = vmatpush3.bf16.msra.mxu0 %v1680_v16  ;;  %1691 = vmatpush3.bf16.msra.mxu1 %v1688_v22 }
 0x371   :  { %1693 = vmatprep.subr.bf16.mxu1 %v1692_v25 }
 0x374   :  { %1695 = vmatpush3.bf16.msra.mxu1 %v1692_v25 }
 0x375   :  { %1697 = vmatprep.subr.bf16.mxu1 %v1696_v29 }
 0x378   :  { %1699 = vmatpush3.bf16.msra.mxu1 %v1696_v29 }
 0x379   :  { %1701 = vmatprep.subr.bf16.mxu1 %v1700_v33 }
 0x37c   :  { %1703 = vmatpush3.bf16.msra.mxu1 %v1700_v33 }
 0x37d   :  { %1705 = vmatprep.subr.bf16.mxu1 %v1704_v45 }
 0x380   :  { %1707 = vmatpush3.bf16.msra.mxu1 %v1704_v45 }
 0x43e   :  { %v1487_v35 = vpop.f32.mrb[6].mxu0  ;;  %v1498_v36 = vpop.f32.mrb[4].mxu1 }
 0x43f   :  { %v1716_v37 = vadd.f32 %v1487_v35, %v2359_v28  ;;  %v829_v38 = vpop.f32.mrb[7].mxu0  ;;  %v917_v39 = vpop.f32.mrb[5].mxu1  ;;  %v923_v42 = vadd.f32 %v1498_v36, %v1232_v34  ;;  %v1013_v28 = vld [vmem:[#allocation14] sm:$0xff] }
 0x440   :  { %v1718_v40 = vadd.f32 %v829_v38, %v2361_v30  ;;  %v918_v41 = vadd.f32 %v1232_v34, %v917_v39  ;;  %v1708_v30 = vpack.c.bf16 %v1014_v46, %v1013_v28 }
 0x441   :  { %v1717_v56 = vadd.f32 %v1716_v37, %v1229_v50 }
 0x442   :  { %1507 = vmatprep.mubr.msk.f32.mxu0 %vm560_vm3, %v918_v41  ;;  %1709 = vmatprep.subr.bf16.mxu1 %v1708_v30  ;;  %v1719_v55 = vadd.f32 %v1718_v40, %v1229_v50 }
 0x443   :  { %1508 = vmatmul.mubr.msk.f32.vlgmr.msra.gmra.mrb[8].mxu0 %vm560_vm3, %v923_v42 }
 0x516   :  { %v1509_v47 = vpop.f32.mrb[8].mxu0 }
 0x517   :  { %v1012_v51 = vmul.f32 %v1509_v47, %v2349_v11  ;;  %v1002_v52 = vpop.f32.mrb[9].mxu0 }
 0x518   :  { %v1011_v53 = vmul.f32 %v1002_v52, %v2352_v15 }
 0x51a   :  { %1534 = vmatprep.mubr.msk.f32.mxu1 %vm179_vm0, %v1011_v53 }
 0x51b   :  { %1535 = vmatmul.mubr.msk.f32.vlgmr.msra.gmra.mrb[6].mxu1 %vm179_vm0, %v1012_v51 }
 0x51c   :  { %1711 = vmatpush3.bf16.msra.mxu1 %v1708_v30  ;;  %1545 = vmatprep.mubr.msk.f32.mxu1 %vm560_vm3, %v1719_v55 }
 0x51d   :  { %1713 = vmatprep.subr.bf16.mxu1 %v1712_v54 }
 0x520   :  { %1715 = vmatpush3.bf16.msra.mxu1 %v1712_v54 }
 0x523   :  { %1546 = vmatmul.mubr.msk.f32.vlgmr.msra.gmra.mrb[6].mxu1 %vm560_vm3, %v1717_v56 }
 0x5f6   :  { %v1547_v11 = vpop.f32.mrb[6].mxu1 }
 0x5f7   :  { %1192 = vst [vmem:[#allocation16 + $0x8] sm:$0xff] %v1547_v11  ;;  %v1182_v15 = vpop.f32.mrb[7].mxu1 }
 0x5f8   :  { %1191 = vst [vmem:[#allocation16] sm:$0xff] %v1182_v15 }
 0x5f9   :  { %1934 = shalt.err (!%p1931_p12)
}
 0x5fa   :  { %s1935_s27 = scalar_lea.hbm %s2457_s16, 256 }
 0x5fb   :  { %p1936_p13 = scmp.ne.s32.totalorder %s2457_s16, %s1935_s27  ;;  %p1939_p0 = scmp.lt.u32.totalorder %s1935_s27, %s2457_s16 }
 0x5fd   :  { %p1941_p1 = pnand %p1939_p0, %p1936_p13 }
 0x5ff   :  { %1944 = shalt.err (!%p1941_p1)
}
 0x600   :  { %1204 = dma.vmem_to_hbm [thread:$0]  %s1199_s15, 256, %s2457_s16, [#allocation4], %s1959_s18, %s1959_s18, %s1960_s19  }
 0x601   :  { %1955 = dma.done.wait [#allocation4], 256  }
 0x602   :  { %1956 = vsyncadd [#allocation4], 4294967040 }
 0x603   :  { %1208 = vsyncpa [#allocation3], 1 }
 0x604   :  { %1209 = vsyncpa [#allocation6], 1 }
 0x605   :  { %1210 = vsyncpa [#allocation9], 1 }
 0x606   :  { %1211 = vsyncpa [#allocation12], 1 }
 0x607   :  { %1212 = vsyncpa [#allocation15], 1 }
 0x608   :  { %1213 = vsyncpa [#allocation4], 1 }

</bundles_post_ra>
